<compile_context>
chip_gen: v6e
topology: v6e:2x2x1
jax: 0.10.0
libtpu: 0.0.40
codegen_flags: <defaults>
</compile_context>

<pallas_src>
import functools
import math

import jax
import jax.numpy as jnp
from jax.experimental import pallas as pl
from jax.experimental.pallas import tpu as pltpu


# --------------------------------------------------------------------------
# VMEM / tiling helpers
# --------------------------------------------------------------------------

def _physical_vmem_bytes():
    """Per-TensorCore physical VMEM; falls back to 128 MiB (v5e/v6e)."""
    try:
        return int(pltpu.get_tpu_info().vmem_capacity_bytes)
    except Exception:
        return 128 * 1024 * 1024


def _pick_tile_rows(rows, row_bytes, budget_bytes, row_cap=4096):
    """Rows per grid step: multiple of 8 (or full extent), <= row_cap,
    output tile <= budget_bytes, and >= 2 grid steps for large outputs."""
    if rows <= 8:
        return rows  # block_shape == full array extent is always legal
    budget_rows = max(8, budget_bytes // max(row_bytes, 1))
    tile = min(row_cap, budget_rows, rows)
    tile = max(8, (tile // 8) * 8)
    # Keep >= 2 grid steps when the output is big enough to amortize the
    # ~0.35 us per-step overhead: lets ("parallel",) shard across v7x's two
    # TensorCores; essentially free on single-TC v5e/v6e.
    if tile >= rows and rows >= 16 and rows * row_bytes >= 2 * 1024 * 1024:
        half = (rows + 1) // 2
        tile = max(8, ((half + 7) // 8) * 8)
    return tile


# --------------------------------------------------------------------------
# Kernels
# --------------------------------------------------------------------------

def _time_kernel(t_ref, freq_ref, out_ref, *, half_dim, dim, aligned):
    """Unpacked time path: out = [sin(t*f) | cos(t*f) | (pad)]."""
    t = t_ref[...]                       # (tile_rows, 1) f32
    freq = freq_ref[...]                 # (1, half_dim) f32, resident
    arg = t * freq                       # broadcast multiply (VPU)
    s = jnp.sin(arg)
    c = jnp.cos(arg)
    if aligned:                          # half_dim % 128 == 0 and dim == 2*half_dim
        out_ref[:, 0:half_dim] = s       # direct 128-aligned slice stores,
        out_ref[:, half_dim:dim] = c     # no concat intermediates
    else:
        parts = [s, c]
        if dim != 2 * half_dim:          # odd dim -> one zero pad column
            parts.append(jnp.zeros((s.shape[0], dim - 2 * half_dim), jnp.float32))
        out_ref[...] = jnp.concatenate(parts, axis=-1)


def _pos_kernel(x_ref, y_ref, freq_ref, out_ref, *, half_dim, dim, aligned):
    """Unpacked position path: out = [sin(x*f) | sin(y*f) | (pad)].

    The PyTorch module slices emb_x/emb_y to [:, :dim//2], which keeps only
    the sin halves, so cos is never computed here."""
    freq = freq_ref[...]                 # (1, half_dim)
    sx = jnp.sin(x_ref[...] * freq)      # (tile_rows, half_dim)
    sy = jnp.sin(y_ref[...] * freq)
    if aligned:
        out_ref[:, 0:half_dim] = sx
        out_ref[:, half_dim:dim] = sy
    else:
        parts = [sx, sy]
        if dim != 2 * half_dim:
            parts.append(jnp.zeros((sx.shape[0], dim - 2 * half_dim), jnp.float32))
        out_ref[...] = jnp.concatenate(parts, axis=-1)


def _time_kernel_packed(t_ref, freq_ref, out_ref, *, half_dim, k):
    """Packed time path (dim < 128, 128 % dim == 0): k logical rows per
    physical row -> exactly 128 output lanes, one unmasked full-width store."""
    t = t_ref[...]                       # (tile_rows, k) f32
    freq = freq_ref[...]                 # (1, half_dim)
    parts = []
    for j in range(k):                   # static unrolled loop (k small)
        arg = t[:, j:j + 1] * freq
        parts.append(jnp.sin(arg))
        parts.append(jnp.cos(arg))
    out_ref[...] = jnp.concatenate(parts, axis=-1)   # (tile_rows, 128)


def _pos_kernel_packed(x_ref, y_ref, freq_ref, out_ref, *, half_dim, k):
    """Packed position path: sin-only, k logical rows per physical row."""
    x = x_ref[...]                       # (tile_rows, k)
    y = y_ref[...]
    freq = freq_ref[...]
    parts = []
    for j in range(k):
        parts.append(jnp.sin(x[:, j:j + 1] * freq))
        parts.append(jnp.sin(y[:, j:j + 1] * freq))
    out_ref[...] = jnp.concatenate(parts, axis=-1)   # (tile_rows, 128)


# --------------------------------------------------------------------------
# Wrapper
# --------------------------------------------------------------------------

def sinusoidal_embedding(x, dim):
    """Pallas implementation of SinusoidalEmbedding.forward.

    x: (N, 1) -> time embedding, or (N, 2) -> position embedding.
    Returns (N, dim) float32.
    """
    if x.ndim != 2 or x.shape[1] not in (1, 2):
        raise ValueError(
            "Input to SinusoidalEmbedding must have shape (N, 1) for time or "
            "(N, 2) for position.")
    if dim < 4:
        # The PyTorch module divides by (dim//2 - 1); dim < 4 divides by zero.
        raise ValueError("SinusoidalEmbedding requires dim >= 4 "
                         "(dim//2 - 1 must be nonzero).")

    n, c = x.shape
    half_dim = dim // 2
    scale = -(math.log(10000.0) / (half_dim - 1))
    freq = jnp.exp(jnp.arange(half_dim, dtype=jnp.float32) * scale)
    freq = freq.reshape(1, half_dim)
    x = x.astype(jnp.float32)

    # Generation-aware VMEM budget (v7x has 64 MiB/TC physical vs 128 MiB).
    small_vmem = _physical_vmem_bytes() <= 64 * 1024 * 1024
    vmem_limit = (48 if small_vmem else 64) * 1024 * 1024
    tile_budget = 8 * 1024 * 1024        # per output tile; 2x buffered = 16 MiB

    # Lane-dense packing for small dims: k logical rows per 128-lane phys row.
    pack = (dim < 128) and (128 % dim == 0)
    if pack:
        k = 128 // dim                   # dim even here -> no pad column needed
        n_pad = ((n + k - 1) // k) * k
        if n_pad != n:
            x = jnp.pad(x, ((0, n_pad - n), (0, 0)))
        rows, out_cols = n_pad // k, 128
    else:
        k, n_pad = 1, n
        rows, out_cols = n, dim

    tile_rows = _pick_tile_rows(rows, out_cols * 4, tile_budget)
    grid = (pl.cdiv(rows, tile_rows),)
    aligned = (half_dim % 128 == 0) and (dim == 2 * half_dim)

    freq_spec = pl.BlockSpec((1, half_dim), lambda i: (0, 0))     # resident
    col_spec = pl.BlockSpec((tile_rows, k), lambda i: (i, 0))
    out_spec = pl.BlockSpec((tile_rows, out_cols), lambda i: (i, 0))
    out_shape = jax.ShapeDtypeStruct((rows, out_cols), jnp.float32)

    if c == 1:  # time path
        if pack:
            t = x.reshape(rows, k)       # free contiguous reshape
            kernel = functools.partial(_time_kernel_packed,
                                       half_dim=half_dim, k=k)
        else:
            t = x
            kernel = functools.partial(_time_kernel, half_dim=half_dim,
                                       dim=dim, aligned=aligned)
        in_specs = [col_spec, freq_spec]
        args = (t, freq)
    else:       # position path: split into two clean column inputs
        xc, yc = x[:, 0:1], x[:, 1:2]
        if pack:
            xc, yc = xc.reshape(rows, k), yc.reshape(rows, k)
            kernel = functools.partial(_pos_kernel_packed,
                                       half_dim=half_dim, k=k)
        else:
            kernel = functools.partial(_pos_kernel, half_dim=half_dim,
                                       dim=dim, aligned=aligned)
        in_specs = [col_spec, col_spec, freq_spec]
        args = (xc, yc, freq)

    out = pl.pallas_call(
        kernel,
        out_shape=out_shape,
        grid=grid,
        in_specs=in_specs,
        out_specs=out_spec,
        compiler_params=pltpu.CompilerParams(
            dimension_semantics=("parallel",),
            vmem_limit_bytes=vmem_limit,
        ),
    )(*args)

    if pack:
        out = out.reshape(n_pad, dim)    # free contiguous reshape
        if n_pad != n:
            out = out[:n]
    return out


# --------------------------------------------------------------------------
# Pure-JAX reference mirroring the PyTorch forward exactly
# --------------------------------------------------------------------------

def _reference(x, dim):
    half_dim = dim // 2
    emb = jnp.exp(jnp.arange(half_dim, dtype=jnp.float32)
                  * (-math.log(10000.0) / (half_dim - 1)))
    if x.shape[1] == 1:
        e = x * emb[None, :]
        e = jnp.concatenate([jnp.sin(e), jnp.cos(e)], axis=-1)
        if dim % 2 == 1:
            e = jnp.pad(e, ((0, 0), (0, 1)))
        return e
    xc, yc = x[:, 0:1], x[:, 1:2]
    ex = jnp.concatenate([jnp.sin(xc * emb[None, :]), jnp.cos(xc * emb[None, :])], -1)
    ey = jnp.concatenate([jnp.sin(yc * emb[None, :]), jnp.cos(yc * emb[None, :])], -1)
    e = jnp.concatenate([ex[:, :half_dim], ey[:, :half_dim]], axis=1)
    if e.shape[1] != dim:
        e = jnp.pad(e, ((0, 0), (0, dim - e.shape[1])))
    return e


if __name__ == "__main__":
    key = jax.random.PRNGKey(0)
    keys = jax.random.split(key, 8)

    def check(x, dim):
        out = jax.block_until_ready(sinusoidal_embedding(x, dim))
        ref = _reference(x.astype(jnp.float32), dim)
        assert out.shape == (x.shape[0], dim), (out.shape, dim)
        assert jnp.allclose(out, ref, atol=2e-5, rtol=2e-5), (
            f"mismatch dim={dim} n={x.shape[0]} c={x.shape[1]} "
            f"max_err={float(jnp.max(jnp.abs(out - ref)))}")

    # --- Small dim: lane-dense packed path (k = 128 // dim rows per slab) ----
    check(jax.random.uniform(keys[0], (8, 1), jnp.float32) * 100.0, 32)   # time
    check(jax.random.uniform(keys[1], (8, 2), jnp.float32) * 10.0, 32)    # pos

    # --- Packed path with N not a multiple of k (pad + slice in wrapper) -----
    check(jax.random.uniform(keys[2], (101, 1), jnp.float32) * 100.0, 64)
    check(jax.random.uniform(keys[3], (101, 2), jnp.float32) * 10.0, 64)

    # --- Large dim: aligned direct-slice-store path, N-tiled grid ------------
    check(jax.random.uniform(keys[4], (1024, 1), jnp.float32) * 100.0, 256)
    check(jax.random.uniform(keys[5], (1024, 2), jnp.float32) * 10.0, 256)

    # --- Odd dim: unaligned concat path with a zero pad column ---------------
    check(jax.random.uniform(keys[6], (16, 1), jnp.float32) * 100.0, 33)
    check(jax.random.uniform(keys[7], (16, 2), jnp.float32) * 10.0, 33)

    print("KERNEL_OK")
</pallas_src>

<mosaic_0001>
module attributes {stable_mosaic.version = 11 : i64} {
  func.func @_time_kernel_packed(%arg0: i32, %arg1: memref<2x4xf32, #tpu.memory_space<vmem>>, %arg2: memref<1x16xf32, #tpu.memory_space<vmem>>, %arg3: memref<2x128xf32, #tpu.memory_space<vmem>>) attributes {dimension_semantics = [#tpu.dimension_semantics<parallel>], iteration_bounds = array<i64: 1>, scalar_prefetch = 0 : i64, scratch_operands = 0 : i64, tpu.core_type = #tpu.core_type<tc>, window_params = [{transform_indices = @transform_0, window_bounds = array<i64: 2, 4>}, {pipeline_mode = #tpu.pipeline_mode<synchronous>, transform_indices = @transform_1, window_bounds = array<i64: 1, 16>}, {transform_indices = @transform_2, window_bounds = array<i64: 2, 128>}]} {
    %c0 = arith.constant 0 : index
    %c0_0 = arith.constant 0 : index
    %0 = vector.load %arg1[%c0, %c0_0] : memref<2x4xf32, #tpu.memory_space<vmem>>, vector<2x4xf32>
    %c0_1 = arith.constant 0 : index
    %c0_2 = arith.constant 0 : index
    %1 = vector.load %arg2[%c0_1, %c0_2] : memref<1x16xf32, #tpu.memory_space<vmem>>, vector<1x16xf32>
    %2 = vector.extract_strided_slice %0 {offsets = [0, 0], sizes = [2, 1], strides = [1, 1]} : vector<2x4xf32> to vector<2x1xf32>
    %3 = vector.broadcast %2 : vector<2x1xf32> to vector<2x16xf32>
    %4 = vector.broadcast %1 : vector<1x16xf32> to vector<2x16xf32>
    %5 = arith.mulf %3, %4 : vector<2x16xf32>
    %6 = math.sin %5 : vector<2x16xf32>
    %7 = math.cos %5 : vector<2x16xf32>
    %8 = vector.extract_strided_slice %0 {offsets = [0, 1], sizes = [2, 1], strides = [1, 1]} : vector<2x4xf32> to vector<2x1xf32>
    %9 = vector.broadcast %8 : vector<2x1xf32> to vector<2x16xf32>
    %10 = vector.broadcast %1 : vector<1x16xf32> to vector<2x16xf32>
    %11 = arith.mulf %9, %10 : vector<2x16xf32>
    %12 = math.sin %11 : vector<2x16xf32>
    %13 = math.cos %11 : vector<2x16xf32>
    %14 = vector.extract_strided_slice %0 {offsets = [0, 2], sizes = [2, 1], strides = [1, 1]} : vector<2x4xf32> to vector<2x1xf32>
    %15 = vector.broadcast %14 : vector<2x1xf32> to vector<2x16xf32>
    %16 = vector.broadcast %1 : vector<1x16xf32> to vector<2x16xf32>
    %17 = arith.mulf %15, %16 : vector<2x16xf32>
    %18 = math.sin %17 : vector<2x16xf32>
    %19 = math.cos %17 : vector<2x16xf32>
    %20 = vector.extract_strided_slice %0 {offsets = [0, 3], sizes = [2, 1], strides = [1, 1]} : vector<2x4xf32> to vector<2x1xf32>
    %21 = vector.broadcast %20 : vector<2x1xf32> to vector<2x16xf32>
    %22 = vector.broadcast %1 : vector<1x16xf32> to vector<2x16xf32>
    %23 = arith.mulf %21, %22 : vector<2x16xf32>
    %24 = math.sin %23 : vector<2x16xf32>
    %25 = math.cos %23 : vector<2x16xf32>
    %26 = tpu.concatenate %6, %7, %12, %13, %18, %19, %24, %25 in 1 : vector<2x16xf32>, vector<2x16xf32>, vector<2x16xf32>, vector<2x16xf32>, vector<2x16xf32>, vector<2x16xf32>, vector<2x16xf32>, vector<2x16xf32> -> vector<2x128xf32>
    %c0_3 = arith.constant 0 : index
    %c0_4 = arith.constant 0 : index
    %27 = vector.load %arg3[%c0_3, %c0_4] : memref<2x128xf32, #tpu.memory_space<vmem>>, vector<2x128xf32>
    tpu.vector_store %arg3[%c0_3, %c0_4], %26 {strides = array<i32>} : memref<2x128xf32, #tpu.memory_space<vmem>>, vector<2x128xf32>,
    return
  }
  func.func @transform_0(%arg0: i32) -> (i32, i32) {
    %c0_i32 = arith.constant 0 : i32
    %c0_i32_0 = arith.constant 0 : i32
    return %arg0, %c0_i32 : i32, i32
  }
  func.func @transform_1(%arg0: i32) -> (i32, i32) {
    %c0_i32 = arith.constant 0 : i32
    %c0_i32_0 = arith.constant 0 : i32
    %c0_i32_1 = arith.constant 0 : i32
    return %c0_i32, %c0_i32_0 : i32, i32
  }
  func.func @transform_2(%arg0: i32) -> (i32, i32) {
    %c0_i32 = arith.constant 0 : i32
    %c0_i32_0 = arith.constant 0 : i32
    return %arg0, %c0_i32 : i32, i32
  }
}

</mosaic_0001>

<bundles_post_ra>
// kernel: tpu_custom_call.1
= control target key start
LH: loop header
LB: loop body
LE: loop exit
PB: predicated region body
PF: predicated region fallthrough
CT: control target
= control target key end

     0   :  { %7 = vsyncpa [#allocation3], 0  ;;  %s1391_s0 = inlined_call_operand.hbm [shape: f32[2,4], index: 0, kind: input, shape index: {}]   ;;  %s1392_s1 = inlined_call_operand.vmem [shape: f32[1,16], index: 1, kind: input, shape index: {}]   ;;  %s1393_s2 = inlined_call_operand.hbm [shape: f32[2,128], index: 2, kind: output, shape index: {}]  }
   0x1   :  { %8 = vsyncpa [#allocation4], 0  ;;  %s1072_s9 = smov [#allocation2]  }
   0x2   :  { %s15_s10 = sshll.u32 %s1072_s9, 4  ;;  %s16_s10 = int_to_ptr.vmem [resolvable:$true] %s15_s10 }
   0x3   :  { %s1036_s11 = scalar_lea.vmem %s16_s10, 32  ;;  %p1041_p1 = scmp.lt.s32.totalorder %s16_s10, %s16_s10 }
   0x4   :  { %p1037_p0 = scmp.ne.s32.totalorder %s16_s10, %s1036_s11  ;;  %p1042_p2 = scmp.lt.s32.totalorder %s1036_s11, %s1036_s11 }
   0x6   :  { %p1043_p3 = por %p1042_p2, %p1041_p1 }
   0x8   :  { %p1044_p4 = pnand %p1043_p3, %p1037_p0 }
   0xa   :  { %1047 = shalt.err (!%p1044_p4)
}
   0xb   :  { %18 = dma.hbm_to_vmem [thread:$0]  %s1391_s0, 32, %s16_s10, [#allocation3]  }
   0xc   :  { %1068 = dma.done.wait [#allocation3], 32  }
   0xd   :  { %1069 = vsyncadd [#allocation3], 4294967264  ;;  %v1073_v0 = vmov 2   ;;  %v1074_v1 = vmov 0   ;;  %v24_v2 = vld [vmem:[#allocation2] sm:$0x3] }
   0xe   :  { %1009 = vset.pattern.permute.xlu1 %v1073_v0  ;;  %1007 = vset.pattern.permute.xlu0 %v1074_v1  ;;  %v1075_v3 = vmov 3   ;;  %v1076_v4 = vmov 1   ;;  %v939_v5 = vld [vmem:[%s1392_s1] ss:$0 sm:$0xff]  ;;  %v1077_v42 = vmov 683565275  }
   0xf   :  { %458 = vperm.xlu1 %1009, %v24_v2   ;;  %28 = vperm.xlu0 %1007, %v24_v2   ;;  %v1078_v44 = vmov 2475754826   ;;  %v1079_v46 = vmov 2131351028   ;;  %v1080_v48 = vmov 2102212464  }
  0x10   :  { %v1081_v50 = vmov 920167782   ;;  %v1082_v58 = vmov 1326507024   ;;  %s1083_s0 = smov 16   ;;  %s1084_s1 = smov 48  }
  0x11   :  { %s1085_s16 = smov 32   ;;  %s1086_s17 = smov 80  }
  0x12   :  { %s1087_s18 = smov 64   ;;  %s1088_s19 = smov 112  }
  0x13   :  { %1010 = vset.pattern.permute.xlu1 %v1075_v3  ;;  %1008 = vset.pattern.permute.xlu0 %v1076_v4  ;;  %s1089_s20 = smov 96   ;;  %s1090_s21 = smov [#allocation5]  }
  0x14   :  { %670 = vperm.xlu1 %1010, %v24_v2   ;;  %246 = vperm.xlu0 %1008, %v24_v2   ;;  %s930_s22 = sshll.u32 %s1090_s21, 4  ;;  %s931_s22 = int_to_ptr.vmem [resolvable:$true] %s930_s22 }
  0x15   :  { %s1048_s23 = scalar_lea.vmem %s931_s22, 32  ;;  %p1053_p6 = scmp.lt.s32.totalorder %s931_s22, %s931_s22 }
  0x16   :  { %p1049_p5 = scmp.ne.s32.totalorder %s931_s22, %s1048_s23  ;;  %p1054_p7 = scmp.lt.s32.totalorder %s1048_s23, %s1048_s23 }
  0x18   :  { %1011 = vset.pattern.permute.xlu0 %v1075_v3  ;;  %p1055_p8 = por %p1054_p7, %p1053_p6 }
  0x1a   :  { %p1056_p9 = pnand %p1055_p8, %p1049_p5 }
  0x8a   :  { %v459_v6 = vpop.permute.xlu1 %458  ;;  %v29_v7 = vpop.permute.xlu0 %28 }
  0x8b   :  { %v1112_v8 = vmul.f32 %v939_v5, %v459_v6  ;;  %v1114_v9 = vmul.f32 %v939_v5, %v29_v7 }
  0x8d   :  { %v462_v10 = vand.u32 2147483647, %v1112_v8  ;;  %v465_v11 = vand.u32 2139095040, %v1112_v8  ;;  %v38_v12 = vand.u32 2147483647, %v1114_v9  ;;  %v41_v13 = vand.u32 2139095040, %v1114_v9 }
  0x8f   :  { %v466_v14 = vshrl.u32 %v465_v11, 23  ;;  %v469_v15 = vand.u32 8388607, %v462_v10  ;;  %v45_v16 = vand.u32 8388607, %v38_v12  ;;  %v671_v17 = vpop.permute.xlu1 %670  ;;  %v42_v18 = vshrl.u32 %v41_v13, 23  ;;  %v247_v21 = vpop.permute.xlu0 %246 }
  0x90   :  { %v1124_v19 = vmul.f32 %v939_v5, %v671_v17  ;;  %v1128_v30 = vmul.f32 %v939_v5, %v247_v21 }
  0x91   :  { %v956_v20 = vadd.s32 4294967169, %v466_v14  ;;  %v470_v22 = vor.u32 8388608, %v469_v15  ;;  %v940_v23 = vadd.s32 4294967169, %v42_v18  ;;  %v46_v26 = vor.u32 8388608, %v45_v16 }
  0x92   :  { %v677_v24 = vand.u32 2139095040, %v1124_v19  ;;  %v674_v28 = vand.u32 2147483647, %v1124_v19  ;;  %v253_v40 = vand.u32 2139095040, %v1128_v30 }
  0x93   :  { %v472_v25 = vadd.s32 1, %v956_v20  ;;  %v48_v27 = vadd.s32 1, %v940_v23  ;;  %v1130_v32 = vshll.u32 %v470_v22, 8  ;;  %v1132_v36 = vshll.u32 %v46_v26, 8 }
  0x94   :  { %v678_v29 = vshrl.u32 %v677_v24, 23  ;;  %v1138_v39 = vand.u32 8388607, %v674_v28 }
  0x95   :  { %vm473_vm0 = vcmp.gt.s32.totalorder %v472_v25, 0  ;;  %vm49_vm1 = vcmp.gt.s32.totalorder %v48_v27, 0 }
  0x96   :  { %v474_v31 = vsel %vm473_vm0, %v472_v25, 0  ;;  %v50_v35 = vsel %vm49_vm1, %v48_v27, 0  ;;  %v964_v38 = vadd.s32 4294967169, %v678_v29 }
  0x97   :  { %v475_v33 = vshrl.u32 %v474_v31, 5  ;;  %v476_v34 = vand.u32 31, %v474_v31  ;;  %v1134_v37 = vand.u32 31, %v50_v35  ;;  %v1146_v52 = vshrl.u32 %v50_v35, 5 }
  0x98   :  { %v684_v2 = vadd.s32 1, %v964_v38 }
  0x99   :  { %v477_v41 = vsub.s32 32, %v476_v34  ;;  %v479_v43 = vshll.u32 %v1077_v42, %v476_v34  ;;  %v482_v45 = vshll.u32 %v1078_v44, %v476_v34  ;;  %v485_v47 = vshll.u32 %v1079_v46, %v476_v34 }
  0x9a   :  { %v488_v49 = vshll.u32 %v1080_v48, %v476_v34  ;;  %v491_v51 = vshll.u32 %v1081_v50, %v476_v34  ;;  %vm494_vm2 = vcmp.lt.s32.totalorder %v475_v33, 1  ;;  %vm496_vm3 = vcmp.lt.s32.totalorder %v475_v33, 3 }
  0x9b   :  { %v478_v53 = vshrl.u32 %v1077_v42, %v477_v41  ;;  %v480_v54 = vshrl.u32 %v1078_v44, %v477_v41  ;;  %v483_v55 = vshrl.u32 %v1079_v46, %v477_v41  ;;  %v486_v56 = vshrl.u32 %v1080_v48, %v477_v41 }
  0x9c   :  { %v489_v57 = vshrl.u32 %v1081_v50, %v477_v41  ;;  %v492_v59 = vshrl.u32 %v1082_v58, %v477_v41  ;;  %vm497_vm4 = vcmp.lt.s32.totalorder %v475_v33, 4  ;;  %v53_v63 = vsub.s32 32, %v1134_v37 }
  0x9d   :  { %v481_v60 = vor.u32 %v480_v54, %v479_v43  ;;  %v484_v61 = vor.u32 %v483_v55, %v482_v45  ;;  %v487_v62 = vor.u32 %v486_v56, %v485_v47  ;;  %vm495_vm5 = vcmp.lt.s32.totalorder %v475_v33, 2 }
  0x9e   :  { %v490_v0 = vor.u32 %v489_v57, %v488_v49  ;;  %v493_v1 = vor.u32 %v492_v59, %v491_v51  ;;  %v55_v14 = vshll.u32 %v1077_v42, %v1134_v37  ;;  %v56_v17 = vshrl.u32 %v1078_v44, %v53_v63 }
  0x9f   :  { %v498_v3 = vsel %vm494_vm2, %v478_v53, %v481_v60  ;;  %v499_v4 = vsel %vm497_vm4, %v487_v62, 2102212464  ;;  %v502_v5 = vsel %vm494_vm2, %v481_v60, %v484_v61  ;;  %v506_v6 = vsel %vm494_vm2, %v484_v61, %v487_v62 }
  0xa0   :  { %v500_v7 = vsel %vm496_vm3, %v484_v61, %v499_v4  ;;  %v503_v11 = vsel %vm497_vm4, %v490_v0, 920167782  ;;  %v507_v13 = vsel %vm497_vm4, %v493_v1, 1326507024  ;;  %v58_v18 = vshll.u32 %v1078_v44, %v1134_v37 }
  0xa1   :  { %v504_v15 = vsel %vm496_vm3, %v487_v62, %v503_v11  ;;  %v508_v16 = vsel %vm496_vm3, %v490_v0, %v507_v13  ;;  %v501_v20 = vsel %vm495_vm5, %v498_v3, %v500_v7  ;;  %v59_v23 = vshrl.u32 %v1079_v46, %v53_v63 }
  0xa2   :  { %v505_v21 = vsel %vm495_vm5, %v502_v5, %v504_v15  ;;  %v509_v22 = vsel %vm495_vm5, %v506_v6, %v508_v16  ;;  %v57_v29 = vor.u32 %v56_v17, %v55_v14  ;;  %v61_v34 = vshll.u32 %v1079_v46, %v1134_v37 }
  0xa3   :  { %v1171_v24 = vmul.u32.u64.low %v1130_v32, %v509_v22  ;;  %v1172_v25 = vmul.u32.u64.high %v1130_v32, %v509_v22, %v1171_v24  ;;  %v1175_v26 = vmul.u32.u64.low %v1130_v32, %v505_v21  ;;  %v1176_v27 = vmul.u32.u64.high %v1130_v32, %v505_v21, %v1175_v26 }
  0xa4   :  { %v60_v31 = vor.u32 %v59_v23, %v58_v18  ;;  %v62_v35 = vshrl.u32 %v1080_v48, %v53_v63  ;;  %v54_v33 = vshrl.u32 %v1077_v42, %v53_v63  ;;  %v64_v38 = vshll.u32 %v1080_v48, %v1134_v37 }
  0xa5   :  { %v65_v41 = vshrl.u32 %v1081_v50, %v53_v63  ;;  %v68_v43 = vshrl.u32 %v1082_v58, %v53_v63  ;;  %v517_v45 = vmul.u32 %v1130_v32, %v501_v20  ;;  %v67_v49 = vshll.u32 %v1081_v50, %v1134_v37 }
  0xa6   :  { %v63_v47 = vor.u32 %v62_v35, %v61_v34  ;;  %vm70_vm6 = vcmp.lt.s32.totalorder %v1146_v52, 1  ;;  %vm519_vm7 = vc.u32 %v1172_v25, %v1175_v26  ;;  %v520_v51 = vadd.s32 1, %v1176_v27 }
  0xa7   :  { %v66_v53 = vor.u32 %v65_v41, %v64_v38  ;;  %vm71_vm8 = vcmp.lt.s32.totalorder %v1146_v52, 2  ;;  %v69_v54 = vor.u32 %v68_v43, %v67_v49  ;;  %vm72_vm9 = vcmp.lt.s32.totalorder %v1146_v52, 3 }
  0xa8   :  { %vm73_vm10 = vcmp.lt.s32.totalorder %v1146_v52, 4  ;;  %v78_v32 = vsel %vm70_vm6, %v57_v29, %v60_v31  ;;  %v521_v55 = vsel %vm519_vm7, %v520_v51, %v1176_v27  ;;  %v82_v57 = vsel %vm70_vm6, %v60_v31, %v63_v47 }
  0xa9   :  { %v75_v56 = vsel %vm73_vm10, %v63_v47, 2102212464  ;;  %v79_v37 = vsel %vm73_vm10, %v66_v53, 920167782  ;;  %v522_v59 = vadd.s32 %v521_v55, %v517_v45  ;;  %v74_v60 = vsel %vm70_vm6, %v54_v33, %v57_v29 }
  0xaa   :  { %v80_v61 = vsel %vm72_vm9, %v63_v47, %v79_v37  ;;  %v83_v62 = vsel %vm73_vm10, %v69_v54, 1326507024  ;;  %v76_v63 = vsel %vm72_vm9, %v60_v31, %v75_v56  ;;  %vm685_vm11 = vcmp.gt.s32.totalorder %v684_v2, 0 }
  0xab   :  { %v81_v0 = vsel %vm71_vm8, %v78_v32, %v80_v61  ;;  %v84_v1 = vsel %vm72_vm9, %v66_v53, %v83_v62  ;;  %v523_v3 = vadd.s32 536870912, %v522_v59  ;;  %v686_v13 = vsel %vm685_vm11, %v684_v2, 0 }
  0xac   :  { %v85_v4 = vsel %vm71_vm8, %v82_v57, %v84_v1  ;;  %v1203_v5 = vmul.u32.u64.low %v1132_v36, %v81_v0  ;;  %v1204_v6 = vmul.u32.u64.high %v1132_v36, %v81_v0, %v1203_v5  ;;  %v77_v15 = vsel %vm71_vm8, %v74_v60, %v76_v63 }
  0xad   :  { %v1208_v7 = vmul.u32.u64.low %v1132_v36, %v85_v4  ;;  %v1209_v11 = vmul.u32.u64.high %v1132_v36, %v85_v4, %v1208_v7  ;;  %v1211_v14 = vshrl.u32 %v523_v3, 30  ;;  %v688_v16 = vand.u32 31, %v686_v13 }
  0xae   :  { %v682_v17 = vor.u32 8388608, %v1138_v39  ;;  %v250_v18 = vand.u32 2147483647, %v1128_v30  ;;  %v254_v20 = vshrl.u32 %v253_v40, 23  ;;  %v96_v22 = vadd.s32 1, %v1204_v6 }
  0xaf   :  { %v525_v21 = vshll.u32 %v1211_v14, 30  ;;  %v689_v23 = vsub.s32 32, %v688_v16  ;;  %v691_v2 = vshll.u32 %v1077_v42, %v688_v16  ;;  %v93_v24 = vmul.u32 %v1132_v36, %v77_v15 }
  0xb0   :  { %vm95_vm12 = vc.u32 %v1209_v11, %v1203_v5  ;;  %v694_v52 = vshll.u32 %v1078_v44, %v688_v16  ;;  %v697_v39 = vshll.u32 %v1079_v46, %v688_v16  ;;  %v687_v29 = vshrl.u32 %v686_v13, 5 }
  0xb1   :  { %v1227_v27 = vsub.s32 %v522_v59, %v525_v21  ;;  %v97_v40 = vsel %vm95_vm12, %v96_v22, %v1204_v6  ;;  %v692_v31 = vshrl.u32 %v1078_v44, %v689_v23  ;;  %v695_v35 = vshrl.u32 %v1079_v46, %v689_v23 }
  0xb2   :  { %v98_v34 = vadd.s32 %v97_v40, %v93_v24  ;;  %v698_v33 = vshrl.u32 %v1080_v48, %v689_v23  ;;  %v700_v36 = vshll.u32 %v1080_v48, %v688_v16  ;;  %v701_v43 = vshrl.u32 %v1081_v50, %v689_v23 }
  0xb3   :  { %v528_v38 = vsub.s32 0, %v1227_v27  ;;  %v693_v41 = vor.u32 %v692_v31, %v691_v2  ;;  %v703_v45 = vshll.u32 %v1081_v50, %v688_v16  ;;  %v696_v49 = vor.u32 %v695_v35, %v694_v52 }
  0xb4   :  { %v99_v47 = vadd.s32 536870912, %v98_v34  ;;  %v699_v51 = vor.u32 %v698_v33, %v697_v39  ;;  %v704_v53 = vshrl.u32 %v1082_v58, %v689_v23  ;;  %v690_v32 = vshrl.u32 %v1077_v42, %v689_v23 }
  0xb5   :  { %v957_v54 = vmin.u32 %v528_v38, %v1227_v27  ;;  %v702_v55 = vor.u32 %v701_v43, %v700_v36  ;;  %vm706_vm13 = vcmp.lt.s32.totalorder %v687_v29, 1  ;;  %vm708_vm14 = vcmp.lt.s32.totalorder %v687_v29, 3 }
  0xb6   :  { %v1240_v56 = vshrl.u32 %v99_v47, 30  ;;  %v705_v37 = vor.u32 %v704_v53, %v703_v45  ;;  %vm709_vm15 = vcmp.lt.s32.totalorder %v687_v29, 4  ;;  %vm707_vm0 = vcmp.lt.s32.totalorder %v687_v29, 2 }
  0xb7   :  { %v530_v57 = vclz %v957_v54  ;;  %v711_v59 = vsel %vm709_vm15, %v699_v51, 2102212464  ;;  %v714_v60 = vsel %vm706_vm13, %v693_v41, %v696_v49  ;;  %v715_v62 = vsel %vm709_vm15, %v702_v55, 920167782 }
  0xb8   :  { %v101_v61 = vshll.u32 %v1240_v56, 30  ;;  %v718_v63 = vsel %vm706_vm13, %v696_v49, %v699_v51  ;;  %v722_v0 = vshll.u32 %v682_v17, 8  ;;  %v710_v1 = vsel %vm706_vm13, %v690_v32, %v693_v41 }
  0xb9   :  { %v716_v3 = vsel %vm708_vm14, %v699_v51, %v715_v62  ;;  %v719_v4 = vsel %vm709_vm15, %v705_v37, 1326507024  ;;  %v948_v6 = vadd.s32 4294967169, %v254_v20  ;;  %v712_v13 = vsel %vm708_vm14, %v696_v49, %v711_v59 }
  0xba   :  { %v102_v7 = vsub.s32 %v98_v34, %v101_v61  ;;  %v717_v15 = vsel %vm707_vm0, %v714_v60, %v716_v3  ;;  %v720_v16 = vsel %vm708_vm14, %v702_v55, %v719_v4  ;;  %v958_v21 = vadd.s32 4294967294, %v530_v57 }
  0xbb   :  { %v721_v22 = vsel %vm707_vm0, %v718_v63, %v720_v16  ;;  %v1248_v23 = vmul.u32.u64.low %v722_v0, %v717_v15  ;;  %v1249_v2 = vmul.u32.u64.high %v722_v0, %v717_v15, %v1248_v23  ;;  %v713_v20 = vsel %vm707_vm0, %v710_v1, %v712_v13 }
  0xbc   :  { %v104_v17 = vsub.s32 0, %v102_v7  ;;  %v1252_v24 = vmul.u32.u64.low %v722_v0, %v721_v22  ;;  %v1253_v52 = vmul.u32.u64.high %v722_v0, %v721_v22, %v1252_v24  ;;  %v260_v39 = vadd.s32 1, %v948_v6 }
  0xbd   :  { %vm959_vm1 = vcmp.lt.s32.totalorder %v958_v21, 0  ;;  %v732_v31 = vadd.s32 1, %v1249_v2  ;;  %v257_v34 = vand.u32 8388607, %v250_v18  ;;  %v729_v33 = vmul.u32 %v722_v0, %v713_v20 }
  0xbe   :  { %v941_v40 = vmin.u32 %v104_v17, %v102_v7  ;;  %vm261_vm2 = vcmp.gt.s32.totalorder %v260_v39, 0  ;;  %vm731_vm3 = vc.u32 %v1253_v52, %v1248_v23  ;;  %v1262_v41 = vsel %vm959_vm1, 0, %v958_v21 }
  0xbf   :  { %v262_v36 = vsel %vm261_vm2, %v260_v39, 0  ;;  %v733_v38 = vsel %vm731_vm3, %v732_v31, %v1249_v2  ;;  %v258_v49 = vor.u32 8388608, %v257_v34  ;;  %v538_v53 = vsub.s32 4294967266, %v1262_v41 }
  0xc0   :  { %v106_v35 = vclz %v941_v40  ;;  %v734_v43 = vadd.s32 %v733_v38, %v729_v33  ;;  %v264_v45 = vand.u32 31, %v262_v36  ;;  %v94_v54 = vadd.s32 %v1203_v5, %v1209_v11 }
  0xc1   :  { %v263_v55 = vshrl.u32 %v262_v36, 5  ;;  %v298_v15 = vshll.u32 %v258_v49, 8  ;;  %vm40_vm5 = vcmp.lt.s32.totalorder %v1114_v9, 0  ;;  %vm39_vm11 = vcmp.le.f32.partialorder %v38_v12, 0.7853982 }
  0xc2   :  { %v942_v29 = vadd.s32 4294967294, %v106_v35  ;;  %v735_v47 = vadd.s32 536870912, %v734_v43  ;;  %v265_v51 = vsub.s32 32, %v264_v45  ;;  %v267_v60 = vshll.u32 %v1077_v42, %v264_v45 }
  0xc3   :  { %v270_v63 = vshll.u32 %v1078_v44, %v264_v45  ;;  %v273_v13 = vshll.u32 %v1079_v46, %v264_v45  ;;  %v276_v22 = vshll.u32 %v1080_v48, %v264_v45  ;;  %v279_v17 = vshll.u32 %v1081_v50, %v264_v45 }
  0xc4   :  { %vm943_vm4 = vcmp.lt.s32.totalorder %v942_v29, 0  ;;  %v1267_v59 = vshrl.u32 %v735_v47, 30  ;;  %v268_v62 = vshrl.u32 %v1078_v44, %v265_v51  ;;  %v271_v0 = vshrl.u32 %v1079_v46, %v265_v51 }
  0xc5   :  { %v109_v32 = vsel %vm943_vm4, 0, %v942_v29  ;;  %v274_v5 = vshrl.u32 %v1080_v48, %v265_v51  ;;  %v277_v2 = vshrl.u32 %v1081_v50, %v265_v51  ;;  %v280_v24 = vshrl.u32 %v1082_v58, %v265_v51 }
  0xc6   :  { %v110_v37 = vsub.s32 32, %v109_v32  ;;  %v114_v57 = vsub.s32 4294967266, %v109_v32  ;;  %v111_v61 = vshll.u32 %v102_v7, %v109_v32  ;;  %v737_v4 = vshll.u32 %v1267_v59, 30 }
  0xc7   :  { %v269_v11 = vor.u32 %v268_v62, %v267_v60  ;;  %v272_v6 = vor.u32 %v271_v0, %v270_v63  ;;  %v275_v44 = vor.u32 %v274_v5, %v273_v13  ;;  %v266_v46 = vshrl.u32 %v1077_v42, %v265_v51 }
  0xc8   :  { %v112_v1 = vshrl.u32 %v94_v54, %v110_v37  ;;  %v115_v3 = vadd.s32 127, %v114_v57  ;;  %v1276_v7 = vsub.s32 %v734_v43, %v737_v4  ;;  %vm282_vm6 = vcmp.lt.s32.totalorder %v263_v55, 1 }
  0xc9   :  { %v278_v31 = vor.u32 %v277_v2, %v276_v22  ;;  %v281_v34 = vor.u32 %v280_v24, %v279_v17  ;;  %vm284_vm7 = vcmp.lt.s32.totalorder %v263_v55, 3  ;;  %vm285_vm8 = vcmp.lt.s32.totalorder %v263_v55, 4 }
  0xca   :  { %v113_v16 = vor.u32 %v112_v1, %v111_v61  ;;  %v116_v21 = vshll.u32 %v115_v3, 23  ;;  %v740_v39 = vsub.s32 0, %v1276_v7  ;;  %v290_v33 = vsel %vm282_vm6, %v269_v11, %v272_v6 }
  0xcb   :  { %v287_v36 = vsel %vm285_vm8, %v275_v44, 2102212464  ;;  %v291_v50 = vsel %vm285_vm8, %v278_v31, 920167782  ;;  %v294_v58 = vsel %vm282_vm6, %v272_v6, %v275_v44  ;;  %v295_v38 = vsel %vm285_vm8, %v281_v34, 1326507024 }
  0xcc   :  { %v117_v20 = vor.u32 4788187, %v116_v21  ;;  %v120_v40 = vcvt.s32.f32 %v113_v16  ;;  %v965_v35 = vmin.u32 %v740_v39, %v1276_v7  ;;  %vm283_vm9 = vcmp.lt.s32.totalorder %v263_v55, 2 }
  0xcd   :  { %v292_v42 = vsel %vm284_vm7, %v275_v44, %v291_v50  ;;  %v286_v45 = vsel %vm282_vm6, %v266_v46, %v269_v11  ;;  %v296_v49 = vsel %vm284_vm7, %v278_v31, %v295_v38  ;;  %v124_v51 = vsub.s32 4, %v1240_v56 }
  0xce   :  { %v118_v48 = vand.u32 2147483647, %v117_v20  ;;  %v742_v43 = vclz %v965_v35  ;;  %v293_v47 = vsel %vm283_vm9, %v290_v33, %v292_v42  ;;  %v288_v37 = vsel %vm284_vm7, %v272_v6, %v287_v36 }
  0xcf   :  { %v297_v57 = vsel %vm283_vm9, %v294_v58, %v296_v49  ;;  %v1296_v62 = vmul.u32.u64.low %v298_v15, %v293_v47  ;;  %v1297_v63 = vmul.u32.u64.high %v298_v15, %v293_v47, %v1296_v62  ;;  %v289_v1 = vsel %vm283_vm9, %v286_v45, %v288_v37 }
  0xd0   :  { %v121_v29 = vmul.f32 %v120_v40, %v118_v48  ;;  %v966_v32 = vadd.s32 4294967294, %v742_v43  ;;  %v1293_v60 = vmul.u32.u64.low %v298_v15, %v297_v57  ;;  %v1294_v61 = vmul.u32.u64.high %v298_v15, %v297_v57, %v1293_v60 }
  0xd1   :  { %v539_v55 = vadd.s32 127, %v538_v53  ;;  %v125_v4 = vsel %vm40_vm5, %v124_v51, %v1240_v56  ;;  %v308_v11 = vadd.s32 1, %v1297_v63  ;;  %v305_v6 = vmul.u32 %v298_v15, %v289_v1 }
  0xd2   :  { %v122_v54 = vxor.u32 2147483648, %v121_v29  ;;  %vm967_vm10 = vcmp.lt.s32.totalorder %v966_v32, 0  ;;  %vm307_vm12 = vc.u32 %v1294_v61, %v1296_v62  ;;  %v127_v13 = vsel %vm39_vm11, 0, %v125_v4 }
  0xd3   :  { %v745_v5 = vsel %vm967_vm10, 0, %v966_v32  ;;  %v309_v12 = vsel %vm307_vm12, %v308_v11, %v1297_v63  ;;  %v534_v53 = vsub.s32 32, %v1262_v41  ;;  %v540_v22 = vshll.u32 %v539_v55, 23 }
  0xd4   :  { %v123_v0 = vsel %vm40_vm5, %v122_v54, %v121_v29  ;;  %v750_v16 = vsub.s32 4294967266, %v745_v5  ;;  %v310_v21 = vadd.s32 %v309_v12, %v305_v6  ;;  %v131_v2 = vadd.s32 3, %v127_v13 }
  0xd5   :  { %v126_v3 = vsel %vm39_vm11, %v1114_v9, %v123_v0  ;;  %v518_v56 = vadd.s32 %v1175_v26, %v1172_v25  ;;  %v541_v39 = vor.u32 4788187, %v540_v22  ;;  %v746_v46 = vsub.s32 32, %v745_v5 }
  0xd6   :  { %1012 = vcosq.f32 %v126_v3  ;;  %v311_v44 = vadd.s32 536870912, %v310_v21  ;;  %v751_v17 = vadd.s32 127, %v750_v16  ;;  %v132_v40 = vand.u32 3, %v131_v2 }
  0xd7   :  { %1014 = vsinq.f32 %v126_v3  ;;  %v536_v20 = vshrl.u32 %v518_v56, %v534_v53  ;;  %v535_v31 = vshll.u32 %v1227_v27, %v1262_v41  ;;  %v235_v34 = vand.u32 3, %v127_v13 }
  0xd8   :  { %v1317_v24 = vshrl.u32 %v311_v44, 30  ;;  %v730_v48 = vadd.s32 %v1248_v23, %v1253_v52  ;;  %v752_v35 = vshll.u32 %v751_v17, 23  ;;  %v542_v26 = vand.u32 2147483647, %v541_v39 }
  0xd9   :  { %v537_v25 = vor.u32 %v536_v20, %v535_v31  ;;  %v747_v50 = vshll.u32 %v1276_v7, %v745_v5  ;;  %vm130_vm13 = vweird.f32 %v1114_v9  ;;  %vm134_vm14 = vcmp.eq.s32.totalorder %v132_v40, 0 }
  0xda   :  { %v313_v15 = vshll.u32 %v1317_v24, 30  ;;  %v748_v38 = vshrl.u32 %v730_v48, %v746_v46  ;;  %vm137_vm15 = vcmp.eq.s32.totalorder %v132_v40, 2  ;;  %vm237_vm0 = vcmp.eq.s32.totalorder %v235_v34, 0 }
  0xdb   :  { %vm240_vm1 = vcmp.eq.s32.totalorder %v235_v34, 2  ;;  %v753_v27 = vor.u32 4788187, %v752_v35  ;;  %vm133_vm2 = vcmp.lt.s32.totalorder %v132_v40, 2  ;;  %vm236_vm3 = vcmp.lt.s32.totalorder %v235_v34, 2 }
  0xdc   :  { %v314_v33 = vsub.s32 %v310_v21, %v313_v15  ;;  %v749_v7 = vor.u32 %v748_v38, %v747_v50  ;;  %v544_v32 = vcvt.s32.f32 %v537_v25  ;;  %v306_v4 = vadd.s32 %v1296_v62, %v1294_v61 }
  0xdd   :  { %v754_v60 = vand.u32 2147483647, %v753_v27  ;;  %vm464_vm5 = vcmp.lt.s32.totalorder %v1112_v8, 0  ;;  %vm676_vm6 = vcmp.lt.s32.totalorder %v1124_v19, 0  ;;  %vm1340_vm7 = vcmp.le.f32.partialorder %v462_v10, 0.7853982 }
  0xde   :  { %v316_v29 = vsub.s32 0, %v314_v33  ;;  %v545_v0 = vmul.f32 %v544_v32, %v542_v26  ;;  %v756_v1 = vcvt.s32.f32 %v749_v7  ;;  %v548_v39 = vsub.s32 4, %v1211_v14 }
  0xdf   :  { %vm1352_vm8 = vcmp.le.f32.partialorder %v674_v28, 0.7853982  ;;  %v336_v40 = vsub.s32 4, %v1317_v24  ;;  %vm252_vm9 = vcmp.lt.s32.totalorder %v1128_v30, 0  ;;  %vm251_vm10 = vcmp.le.f32.partialorder %v250_v18, 0.7853982 }
  0xe0   :  { %v949_v23 = vmin.u32 %v316_v29, %v314_v33  ;;  %v757_v55 = vmul.f32 %v756_v1, %v754_v60  ;;  %v546_v6 = vxor.u32 2147483648, %v545_v0  ;;  %v549_v28 = vsel %vm464_vm5, %v548_v39, %v1211_v14 }
  0xe1   :  { %v760_v48 = vsub.s32 4, %v1267_v59  ;;  %v337_v35 = vsel %vm252_vm9, %v336_v40, %v1317_v24  ;;  %vm342_vm11 = vweird.f32 %v1128_v30 }
  0xe2   :  { %v318_v49 = vclz %v949_v23  ;;  %v758_v16 = vxor.u32 2147483648, %v757_v55  ;;  %v547_v22 = vsel %vm464_vm5, %v546_v6, %v545_v0 }
  0xe3   :  { %v1013_v36 = vpop.eup %1012  ;;  %v550_v17 = vsel %vm1340_vm7, %v1112_v8, %v547_v22  ;;  %v761_v18 = vsel %vm676_vm6, %v760_v48, %v1267_v59 }
  0xe4   :  { %v1015_v58 = vpop.eup %1014  ;;  %v138_v43 = vxor.u32 2147483648, %v1013_v36  ;;  %v950_v63 = vadd.s32 4294967294, %v318_v49  ;;  %v759_v62 = vsel %vm676_vm6, %v758_v16, %v757_v55  ;;  %1016 = vcosq.f32 %v550_v17 }
  0xe5   :  { %v135_v42 = vxor.u32 2147483648, %v1015_v58  ;;  %v762_v10 = vsel %vm1352_vm8, %v1124_v19, %v759_v62  ;;  %1018 = vsinq.f32 %v550_v17  ;;  %v763_v26 = vsel %vm1352_vm8, 0, %v761_v18 }
  0xe6   :  { %v242_v52 = vsel %vm240_vm1, %v138_v43, %v1015_v58  ;;  %v139_v41 = vsel %vm137_vm15, %v138_v43, %v1015_v58  ;;  %vm951_vm4 = vcmp.lt.s32.totalorder %v950_v63, 0  ;;  %1020 = vcosq.f32 %v762_v10 }
  0xe7   :  { %v239_v45 = vsel %vm237_vm0, %v1013_v36, %v135_v42  ;;  %v136_v47 = vsel %vm134_vm14, %v1013_v36, %v135_v42  ;;  %v321_v3 = vsel %vm951_vm4, 0, %v950_v63  ;;  %1022 = vsinq.f32 %v762_v10 }
  0xe8   :  { %v243_v51 = vsel %vm236_vm3, %v239_v45, %v242_v52  ;;  %v140_v54 = vsel %vm133_vm2, %v136_v47, %v139_v41  ;;  %v322_v5 = vsub.s32 32, %v321_v3  ;;  %v326_v11 = vsub.s32 4294967266, %v321_v3 }
  0xe9   :  { %v244_v37 = vsel %vm130_vm13, nan, %v243_v51  ;;  %v1330_v57 = vsel %vm130_vm13, nan, %v140_v54  ;;  %v323_v12 = vshll.u32 %v314_v33, %v321_v3  ;;  %v551_v33 = vsel %vm1340_vm7, 0, %v549_v28 }
  0xea   :  { %882 = vrot.lane.b32.xlu1 %v244_v37, %s1083_s0  ;;  %v324_v13 = vshrl.u32 %v306_v4, %v322_v5  ;;  %v327_v9 = vadd.s32 127, %v326_v11  ;;  %v339_v36 = vsel %vm251_vm10, 0, %v337_v35  ;;  %v555_v25 = vadd.s32 3, %v551_v33 }
  0xeb   :  { %v343_v14 = vadd.s32 3, %v339_v36  ;;  %v659_v50 = vand.u32 3, %v551_v33  ;;  %v447_v24 = vand.u32 3, %v339_v36  ;;  %v767_v43 = vadd.s32 3, %v763_v26 }
  0xec   :  { %v325_v21 = vor.u32 %v324_v13, %v323_v12  ;;  %v328_v53 = vshll.u32 %v327_v9, 23  ;;  %v556_v38 = vand.u32 3, %v555_v25  ;;  %v871_v59 = vand.u32 3, %v763_v26 }
  0xed   :  { %v344_v42 = vand.u32 3, %v343_v14  ;;  %vm661_vm12 = vcmp.eq.s32.totalorder %v659_v50, 0  ;;  %vm664_vm13 = vcmp.eq.s32.totalorder %v659_v50, 2  ;;  %vm448_vm15 = vcmp.lt.s32.totalorder %v447_v24, 2 }
  0xee   :  { %v329_v44 = vor.u32 4788187, %v328_v53  ;;  %v332_v56 = vcvt.s32.f32 %v325_v21  ;;  %vm558_vm14 = vcmp.eq.s32.totalorder %v556_v38, 0  ;;  %vm449_vm0 = vcmp.eq.s32.totalorder %v447_v24, 0 }
  0xef   :  { %vm561_vm1 = vcmp.eq.s32.totalorder %v556_v38, 2  ;;  %v768_v47 = vand.u32 3, %v767_v43  ;;  %vm452_vm2 = vcmp.eq.s32.totalorder %v447_v24, 2  ;;  %vm345_vm3 = vcmp.lt.s32.totalorder %v344_v42, 2 }
  0xf0   :  { %v330_v2 = vand.u32 2147483647, %v329_v44  ;;  %vm346_vm4 = vcmp.eq.s32.totalorder %v344_v42, 0  ;;  %vm349_vm5 = vcmp.eq.s32.totalorder %v344_v42, 2  ;;  %vm660_vm6 = vcmp.lt.s32.totalorder %v659_v50, 2 }
  0xf1   :  { %v1017_v58 = vpop.eup %1016  ;;  %vm557_vm7 = vcmp.lt.s32.totalorder %v556_v38, 2  ;;  %vm873_vm8 = vcmp.eq.s32.totalorder %v871_v59, 0 }
  0xf2   :  { %v333_v20 = vmul.f32 %v332_v56, %v330_v2  ;;  %v1019_v29 = vpop.eup %1018  ;;  %v562_v23 = vxor.u32 2147483648, %v1017_v58 }
  0xf3   :  { %v1021_v27 = vpop.eup %1020  ;;  %v559_v41 = vxor.u32 2147483648, %v1019_v29 }
  0xf4   :  { %v334_v15 = vxor.u32 2147483648, %v333_v20  ;;  %v1023_v52 = vpop.eup %1022  ;;  %v666_v54 = vsel %vm664_vm13, %v562_v23, %v1019_v29  ;;  %v563_v32 = vsel %vm561_vm1, %v562_v23, %v1019_v29  ;;  %v774_v4 = vxor.u32 2147483648, %v1021_v27 }
  0xf5   :  { %v663_v63 = vsel %vm661_vm12, %v1017_v58, %v559_v41  ;;  %v560_v0 = vsel %vm558_vm14, %v1017_v58, %v559_v41  ;;  %v771_v55 = vxor.u32 2147483648, %v1023_v52  ;;  %vm773_vm12 = vcmp.eq.s32.totalorder %v768_v47, 2 }
  0xf6   :  { %v335_v31 = vsel %vm252_vm9, %v334_v15, %v333_v20  ;;  %vm876_vm9 = vcmp.eq.s32.totalorder %v871_v59, 2  ;;  %v667_v13 = vsel %vm660_vm6, %v663_v63, %v666_v54  ;;  %v564_v9 = vsel %vm557_vm7, %v560_v0, %v563_v32 }
  0xf7   :  { %v338_v34 = vsel %vm251_vm10, %v1128_v30, %v335_v31  ;;  %vm770_vm10 = vcmp.eq.s32.totalorder %v768_v47, 0  ;;  %v875_v16 = vsel %vm873_vm8, %v1021_v27, %v771_v55  ;;  %v878_v21 = vsel %vm876_vm9, %v774_v4, %v1023_v52 }
  0xf8   :  { %1024 = vcosq.f32 %v338_v34  ;;  %v772_v53 = vsel %vm770_vm10, %v1021_v27, %v771_v55  ;;  %v775_v22 = vsel %vm773_vm12, %v774_v4, %v1023_v52  ;;  %vm554_vm13 = vweird.f32 %v1112_v8 }
  0xf9   :  { %1026 = vsinq.f32 %v338_v34  ;;  %v668_v44 = vsel %vm554_vm13, nan, %v667_v13  ;;  %v565_v61 = vsel %vm554_vm13, nan, %v564_v9  ;;  %vm872_vm14 = vcmp.lt.s32.totalorder %v871_v59, 2 }
  0xfa   :  { %v879_v30 = vsel %vm872_vm14, %v875_v16, %v878_v21  ;;  %vm911_vm1 = vcmask 261120   ;;  %vm921_vm6 = vcmask 916480  }
 0x105   :  { %v1025_v45 = vpop.eup %1024 }
 0x106   :  { %v1027_v7 = vpop.eup %1026  ;;  %v350_v49 = vxor.u32 2147483648, %v1025_v45 }
 0x107   :  { %v347_v51 = vxor.u32 2147483648, %v1027_v7 }
 0x108   :  { %v454_v37 = vsel %vm452_vm2, %v350_v49, %v1027_v7  ;;  %v351_v60 = vsel %vm349_vm5, %v350_v49, %v1027_v7  ;;  %vm913_vm2 = vcmask 392192   ;;  %vm919_vm5 = vcmask 785408  }
 0x109   :  { %v451_v1 = vsel %vm449_vm0, %v1025_v45, %v347_v51  ;;  %v348_v3 = vsel %vm346_vm4, %v1025_v45, %v347_v51  ;;  %vm909_vm0 = vcmask 130048   ;;  %vm917_vm4 = vcmask 654336  }
 0x10a   :  { %v455_v5 = vsel %vm448_vm15, %v451_v1, %v454_v37  ;;  %v352_v11 = vsel %vm345_vm3, %v348_v3, %v351_v60  ;;  %vm766_vm15 = vweird.f32 %v1124_v19  ;;  %vm915_vm3 = vcmask 523264  }
 0x10b   :  { %v456_v6 = vsel %vm342_vm11, nan, %v455_v5  ;;  %v353_v12 = vsel %vm342_vm11, nan, %v352_v11  ;;  %vm769_vm11 = vcmp.lt.s32.totalorder %v768_v47, 2  ;;  %v880_v2 = vsel %vm766_vm15, nan, %v879_v30 }
 0x10c   :  { %890 = vrot.lane.b32.xlu1 %v456_v6, %s1084_s1  ;;  %886 = vrot.lane.b32.xlu0 %v353_v12, %s1085_s16  ;;  %v776_v62 = vsel %vm769_vm11, %v772_v53, %v775_v22 }
 0x10d   :  { %v777_v56 = vsel %vm766_vm15, nan, %v776_v62 }
 0x110   :  { %898 = vrot.lane.b32.xlu1 %v668_v44, %s1086_s17  ;;  %894 = vrot.lane.b32.xlu0 %v565_v61, %s1087_s18 }
 0x114   :  { %906 = vrot.lane.b32.xlu1 %v880_v2, %s1088_s19  ;;  %902 = vrot.lane.b32.xlu0 %v777_v56, %s1089_s20 }
 0x15c   :  { %v883_v17 = vpop.permute.xlu1 %882 }
 0x15d   :  { %v910_v8 = vsel %vm909_vm0, %v1330_v57, %v883_v17 }
 0x17e   :  { %v891_v20 = vpop.permute.xlu1 %890  ;;  %v887_v39 = vpop.permute.xlu0 %886 }
 0x17f   :  { %v912_v46 = vsel %vm911_vm1, %v910_v8, %v887_v39 }
 0x180   :  { %v914_v15 = vsel %vm913_vm2, %v912_v46, %v891_v20 }
 0x182   :  { %v899_v10 = vpop.permute.xlu1 %898  ;;  %v895_v40 = vpop.permute.xlu0 %894 }
 0x183   :  { %v916_v19 = vsel %vm915_vm3, %v914_v15, %v895_v40 }
 0x184   :  { %v918_v28 = vsel %vm917_vm4, %v916_v19, %v899_v10 }
 0x186   :  { %v907_v31 = vpop.permute.xlu1 %906  ;;  %v903_v34 = vpop.permute.xlu0 %902 }
 0x187   :  { %v920_v48 = vsel %vm919_vm5, %v918_v28, %v903_v34 }
 0x188   :  { %v922_v57 = vsel %vm921_vm6, %v920_v48, %v907_v31 }
 0x189   :  { %923 = vst [vmem:[#allocation5] sm:$0x3] %v922_v57 }
 0x18a   :  { %1059 = shalt.err (!%p1056_p9)
}
 0x18b   :  { %933 = dma.vmem_to_hbm [thread:$0]  %s931_s22, 32, %s1393_s2, [#allocation4]  }
 0x18c   :  { %1070 = dma.done.wait [#allocation4], 32  }
 0x18d   :  { %1071 = vsyncadd [#allocation4], 4294967264 }
 0x18e   :  { %937 = vsyncpa [#allocation3], 1 }
 0x18f   :  { %938 = vsyncpa [#allocation4], 1 }

</bundles_post_ra>
